<compile_context>
chip_gen: v7x
topology: tpu7x:2x2x1
jax: 0.10.0
libtpu: 0.0.40
codegen_flags: <defaults>
</compile_context>

<pallas_src>
import functools

import jax
import jax.numpy as jnp
from jax.experimental import pallas as pl
from jax.experimental.pallas import tpu as pltpu


def _linear_agg_kernel(q_ref, v_ref, wq_ref, bq_ref, wk_ref, bk_ref, out_ref,
                       *, num_heads, depth):
    # q_ref  : (1, Bblk, D)      blocked query tokens (Lq == 1)
    # v_ref  : (1, Bblk, Lk, D)  blocked visual_value (K input AND the raw value)
    # wq_ref : (D, D)  Wq^T, pre-scaled by 1/sqrt(depth);  bq_ref: (1, D) scaled
    # wk_ref : (D, D)  Wk^T;                               bk_ref: (1, D)
    # out_ref: (1, Bblk, D)      per-row contexts, heads concatenated in lanes
    _, bblk, lk, d = v_ref.shape

    q_in = q_ref[...].reshape(bblk, d)           # leading-dim-only reshape
    v_in = v_ref[...].reshape(bblk, lk, d)       # leading-dim-only reshape
    v_flat = v_in.reshape(bblk * lk, d)          # collapse to one matmul operand

    # Single full-width MXU matmul per projection over the whole batch block.
    q = jnp.dot(q_in, wq_ref[...], preferred_element_type=jnp.float32) + bq_ref[...]    # (Bblk, D)
    k = jnp.dot(v_flat, wk_ref[...], preferred_element_type=jnp.float32) + bk_ref[...]  # (Bblk*Lk, D)
    k = k.reshape(bblk, lk, d)

    # Lq == 1: scores are a broadcast-multiply + per-head lane reduce (no MXU).
    prod = q[:, None, :] * k                     # (Bblk, Lk, D)

    for h in range(num_heads):                   # statically unrolled, H is small
        lo = h * depth
        hi = lo + depth
        s = jnp.sum(prod[:, :, lo:hi], axis=-1, keepdims=True)    # (Bblk, Lk, 1)
        s = s - jnp.max(s, axis=1, keepdims=True)                 # stable softmax over keys
        e = jnp.exp(s)
        attn = e / jnp.sum(e, axis=1, keepdims=True)              # exact normalization
        ctx = jnp.sum(attn * v_in[:, :, lo:hi], axis=1)           # (Bblk, depth)
        out_ref[0, :, lo:hi] = ctx.astype(out_ref.dtype)          # lane-slice store


def linear_aggregation(query_vt, visual_value, wq, bq, wk, bk, num_heads,
                       block_b=None):
    """LinearAggregation.forward: MultiHeadCrossAttention(is_compress=True) + squeeze(1)."""
    B, Lq, D = query_vt.shape
    Bv, Lk, Dv = visual_value.shape
    assert Bv == B and Dv == D
    assert D % num_heads == 0
    # TODO(synk): only the Lq == 1 (single learned query token) path is implemented;
    # that is the configuration LinearAggregation's .squeeze(1) targets.
    assert Lq == 1, "LinearAggregation expects a single query token (Lq == 1)"
    depth = D // num_heads

    if block_b is None:
        # <=2 grid steps: keeps both v7x TensorCores busy via the "parallel"
        # axis; on single-TC v5e/v6e pass block_b=B to fully fuse the batch.
        block_b = B // 2 if (B > 1 and B % 2 == 0) else B
    assert B % block_b == 0
    num_blocks = B // block_b

    # torch Linear: y = x @ W.T + b  ->  pre-transpose; fold 1/sqrt(depth) into
    # the query projection (f32, so no double-rounding concern).
    scale = 1.0 / jnp.sqrt(jnp.float32(depth))
    wq_t = (wq.T * scale).astype(jnp.float32)               # (D, D)
    bq_s = (bq * scale).reshape(1, D).astype(jnp.float32)   # (1, D)
    wk_t = wk.T.astype(jnp.float32)                         # (D, D)
    bk_r = bk.reshape(1, D).astype(jnp.float32)             # (1, D)

    # Metadata-only host views: blocked batch layout with trailing dims intact.
    q_blocks = query_vt.reshape(num_blocks, block_b, D)
    v_blocks = visual_value.reshape(num_blocks, block_b, Lk, D)

    kernel = functools.partial(_linear_agg_kernel, num_heads=num_heads, depth=depth)

    out = pl.pallas_call(
        kernel,
        out_shape=jax.ShapeDtypeStruct((num_blocks, block_b, D), query_vt.dtype),
        grid_spec=pltpu.PrefetchScalarGridSpec(
            num_scalar_prefetch=0,
            grid=(num_blocks,),
            in_specs=[
                pl.BlockSpec((1, block_b, D), lambda i: (i, 0, 0)),        # query block
                pl.BlockSpec((1, block_b, Lk, D), lambda i: (i, 0, 0, 0)), # value block
                pl.BlockSpec((D, D), lambda i: (0, 0)),                    # Wq^T (VMEM resident)
                pl.BlockSpec((1, D), lambda i: (0, 0)),                    # bq
                pl.BlockSpec((D, D), lambda i: (0, 0)),                    # Wk^T (VMEM resident)
                pl.BlockSpec((1, D), lambda i: (0, 0)),                    # bk
            ],
            out_specs=pl.BlockSpec((1, block_b, D), lambda i: (i, 0, 0)),
        ),
        compiler_params=pltpu.CompilerParams(
            dimension_semantics=("parallel",)),   # 2-way split across v7x TCs
    )(q_blocks, v_blocks, wq_t, bq_s, wk_t, bk_r)

    # torch: context.view(B, -1, D).squeeze(1) -> (B, D); metadata-only reshape.
    return out.reshape(B, D)


def _xavier_uniform(key, shape):
    fan_out, fan_in = shape
    limit = (6.0 / (fan_in + fan_out)) ** 0.5
    return jax.random.uniform(key, shape, jnp.float32, -limit, limit)


def _reference(query_vt, visual_value, wq, bq, wk, bk, num_heads):
    """Pure-JAX replica of the PyTorch forward (is_compress=True) for validation."""
    B, Lq, D = query_vt.shape
    Lk = visual_value.shape[1]
    depth = D // num_heads
    q = query_vt @ wq.T + bq
    k = visual_value @ wk.T + bk
    v = visual_value

    def split(x, L):
        return x.reshape(B, L, num_heads, depth).transpose(0, 2, 1, 3)

    qh, kh, vh = split(q, Lq), split(k, Lk), split(v, Lk)
    scores = jnp.einsum('bhqd,bhkd->bhqk', qh, kh) / jnp.sqrt(jnp.float32(depth))
    attn = jax.nn.softmax(scores, axis=-1)
    ctx = jnp.einsum('bhqk,bhkd->bhqd', attn, vh)
    ctx = ctx.transpose(0, 2, 1, 3).reshape(B, Lq, D)
    return jnp.squeeze(ctx, axis=1)


if __name__ == "__main__":
    d_model, num_heads = 32, 4
    B, Lq, Lk = 4, 1, 8   # query_vt is a single learned query token per batch row

    key = jax.random.PRNGKey(0)
    k_wq, k_wk, k_q, k_v = jax.random.split(key, 4)

    # Deterministic params matching the module's init_weights (xavier_uniform
    # weights, zero biases). wv / dense are never used when is_compress=True.
    wq = _xavier_uniform(k_wq, (d_model, d_model))
    wk = _xavier_uniform(k_wk, (d_model, d_model))
    bq = jnp.zeros((d_model,), jnp.float32)
    bk = jnp.zeros((d_model,), jnp.float32)

    query_vt = jax.random.normal(k_q, (B, Lq, d_model), jnp.float32)
    visual_value = jax.random.normal(k_v, (B, Lk, d_model), jnp.float32)

    out = linear_aggregation(query_vt, visual_value, wq, bq, wk, bk, num_heads)
    out = jax.block_until_ready(out)

    ref = _reference(query_vt, visual_value, wq, bq, wk, bk, num_heads)
    assert out.shape == (B, d_model), out.shape
    assert jnp.allclose(out, ref, atol=1e-4, rtol=1e-4), float(jnp.max(jnp.abs(out - ref)))

    print("KERNEL_OK")
</pallas_src>

<mosaic_0001>
module attributes {stable_mosaic.version = 11 : i64} {
  func.func @_linear_agg_kernel(%arg0: i32, %arg1: memref<1x2x32xf32, #tpu.memory_space<vmem>>, %arg2: memref<1x2x8x32xf32, #tpu.memory_space<vmem>>, %arg3: memref<32x32xf32, #tpu.memory_space<vmem>>, %arg4: memref<1x32xf32, #tpu.memory_space<vmem>>, %arg5: memref<32x32xf32, #tpu.memory_space<vmem>>, %arg6: memref<1x32xf32, #tpu.memory_space<vmem>>, %arg7: memref<1x2x32xf32, #tpu.memory_space<vmem>>) attributes {dimension_semantics = [#tpu.dimension_semantics<parallel>], iteration_bounds = array<i64: 2>, scalar_prefetch = 0 : i64, scratch_operands = 0 : i64, tpu.core_type = #tpu.core_type<tc>, window_params = [{transform_indices = @transform_0, window_bounds = array<i64: 1, 2, 32>}, {transform_indices = @transform_1, window_bounds = array<i64: 1, 2, 8, 32>}, {pipeline_mode = #tpu.pipeline_mode<synchronous>, transform_indices = @transform_2, window_bounds = array<i64: 32, 32>}, {pipeline_mode = #tpu.pipeline_mode<synchronous>, transform_indices = @transform_3, window_bounds = array<i64: 1, 32>}, {pipeline_mode = #tpu.pipeline_mode<synchronous>, transform_indices = @transform_4, window_bounds = array<i64: 32, 32>}, {pipeline_mode = #tpu.pipeline_mode<synchronous>, transform_indices = @transform_5, window_bounds = array<i64: 1, 32>}, {transform_indices = @transform_6, window_bounds = array<i64: 1, 2, 32>}]} {
    %c0 = arith.constant 0 : index
    %c0_0 = arith.constant 0 : index
    %c0_1 = arith.constant 0 : index
    %0 = vector.load %arg1[%c0, %c0_0, %c0_1] : memref<1x2x32xf32, #tpu.memory_space<vmem>>, vector<1x2x32xf32>
    %1 = vector.shape_cast %0 : vector<1x2x32xf32> to vector<2x32xf32>
    %c0_2 = arith.constant 0 : index
    %c0_3 = arith.constant 0 : index
    %c0_4 = arith.constant 0 : index
    %c0_5 = arith.constant 0 : index
    %2 = vector.load %arg2[%c0_2, %c0_3, %c0_4, %c0_5] : memref<1x2x8x32xf32, #tpu.memory_space<vmem>>, vector<1x2x8x32xf32>
    %3 = vector.shape_cast %2 : vector<1x2x8x32xf32> to vector<2x8x32xf32>
    %4 = vector.shape_cast %3 : vector<2x8x32xf32> to vector<16x32xf32>
    %c0_6 = arith.constant 0 : index
    %c0_7 = arith.constant 0 : index
    %5 = vector.load %arg3[%c0_6, %c0_7] : memref<32x32xf32, #tpu.memory_space<vmem>>, vector<32x32xf32>
    %cst = arith.constant dense<0.000000e+00> : vector<2x32xf32>
    %6 = tpu.matmul %1, %5, %cst {dimension_numbers = #tpu.dot_dimension_numbers<[1], [0], [0], [1], [0, 0, 1, 1], [], []>} : vector<2x32xf32>, vector<32x32xf32>, vector<2x32xf32> -> vector<2x32xf32>
    %c0_8 = arith.constant 0 : index
    %c0_9 = arith.constant 0 : index
    %7 = vector.load %arg4[%c0_8, %c0_9] : memref<1x32xf32, #tpu.memory_space<vmem>>, vector<1x32xf32>
    %8 = vector.broadcast %7 : vector<1x32xf32> to vector<2x32xf32>
    %9 = arith.addf %6, %8 : vector<2x32xf32>
    %c0_10 = arith.constant 0 : index
    %c0_11 = arith.constant 0 : index
    %10 = vector.load %arg5[%c0_10, %c0_11] : memref<32x32xf32, #tpu.memory_space<vmem>>, vector<32x32xf32>
    %cst_12 = arith.constant dense<0.000000e+00> : vector<16x32xf32>
    %11 = tpu.matmul %4, %10, %cst_12 {dimension_numbers = #tpu.dot_dimension_numbers<[1], [0], [0], [1], [0, 0, 1, 1], [], []>} : vector<16x32xf32>, vector<32x32xf32>, vector<16x32xf32> -> vector<16x32xf32>
    %c0_13 = arith.constant 0 : index
    %c0_14 = arith.constant 0 : index
    %12 = vector.load %arg6[%c0_13, %c0_14] : memref<1x32xf32, #tpu.memory_space<vmem>>, vector<1x32xf32>
    %13 = vector.broadcast %12 : vector<1x32xf32> to vector<16x32xf32>
    %14 = arith.addf %11, %13 : vector<16x32xf32>
    %15 = vector.shape_cast %14 : vector<16x32xf32> to vector<2x8x32xf32>
    %16 = vector.shape_cast %9 : vector<2x32xf32> to vector<2x1x32xf32>
    %17 = vector.broadcast %16 : vector<2x1x32xf32> to vector<2x8x32xf32>
    %18 = arith.mulf %17, %15 : vector<2x8x32xf32>
    %19 = vector.extract_strided_slice %18 {offsets = [0, 0, 0], sizes = [2, 8, 8], strides = [1, 1, 1]} : vector<2x8x32xf32> to vector<2x8x8xf32>
    %cst_15 = arith.constant dense<0.000000e+00> : vector<2x8xf32>
    %20 = vector.multi_reduction <add>, %19, %cst_15 [2] : vector<2x8x8xf32> to vector<2x8xf32>
    %21 = vector.shape_cast %20 : vector<2x8xf32> to vector<2x8x1xf32>
    %cst_16 = arith.constant dense<0xFF800000> : vector<2x1xf32>
    %22 = vector.multi_reduction <maximumf>, %21, %cst_16 [1] : vector<2x8x1xf32> to vector<2x1xf32>
    %23 = vector.shape_cast %22 : vector<2x1xf32> to vector<2x1x1xf32>
    %24 = vector.broadcast %23 : vector<2x1x1xf32> to vector<2x8x1xf32>
    %25 = arith.subf %21, %24 : vector<2x8x1xf32>
    %26 = math.exp %25 : vector<2x8x1xf32>
    %cst_17 = arith.constant dense<0.000000e+00> : vector<2x1xf32>
    %27 = vector.multi_reduction <add>, %26, %cst_17 [1] : vector<2x8x1xf32> to vector<2x1xf32>
    %28 = vector.shape_cast %27 : vector<2x1xf32> to vector<2x1x1xf32>
    %29 = vector.broadcast %28 : vector<2x1x1xf32> to vector<2x8x1xf32>
    %30 = arith.divf %26, %29 : vector<2x8x1xf32>
    %31 = vector.extract_strided_slice %3 {offsets = [0, 0, 0], sizes = [2, 8, 8], strides = [1, 1, 1]} : vector<2x8x32xf32> to vector<2x8x8xf32>
    %32 = vector.broadcast %30 : vector<2x8x1xf32> to vector<2x8x8xf32>
    %33 = arith.mulf %32, %31 : vector<2x8x8xf32>
    %cst_18 = arith.constant dense<0.000000e+00> : vector<2x8xf32>
    %34 = vector.multi_reduction <add>, %33, %cst_18 [1] : vector<2x8x8xf32> to vector<2x8xf32>
    %c0_19 = arith.constant 0 : index
    %c0_20 = arith.constant 0 : index
    %c0_21 = arith.constant 0 : index
    %35 = vector.load %arg7[%c0_19, %c0_20, %c0_21] : memref<1x2x32xf32, #tpu.memory_space<vmem>>, vector<1x2x8xf32>
    %36 = vector.shape_cast %35 : vector<1x2x8xf32> to vector<2x8xf32>
    %37 = vector.shape_cast %34 : vector<2x8xf32> to vector<1x2x8xf32>
    tpu.vector_store %arg7[%c0_19, %c0_20, %c0_21], %37 {strides = array<i32>} : memref<1x2x32xf32, #tpu.memory_space<vmem>>, vector<1x2x8xf32>,
    %38 = vector.extract_strided_slice %18 {offsets = [0, 0, 8], sizes = [2, 8, 8], strides = [1, 1, 1]} : vector<2x8x32xf32> to vector<2x8x8xf32>
    %cst_22 = arith.constant dense<0.000000e+00> : vector<2x8xf32>
    %39 = vector.multi_reduction <add>, %38, %cst_22 [2] : vector<2x8x8xf32> to vector<2x8xf32>
    %40 = vector.shape_cast %39 : vector<2x8xf32> to vector<2x8x1xf32>
    %cst_23 = arith.constant dense<0xFF800000> : vector<2x1xf32>
    %41 = vector.multi_reduction <maximumf>, %40, %cst_23 [1] : vector<2x8x1xf32> to vector<2x1xf32>
    %42 = vector.shape_cast %41 : vector<2x1xf32> to vector<2x1x1xf32>
    %43 = vector.broadcast %42 : vector<2x1x1xf32> to vector<2x8x1xf32>
    %44 = arith.subf %40, %43 : vector<2x8x1xf32>
    %45 = math.exp %44 : vector<2x8x1xf32>
    %cst_24 = arith.constant dense<0.000000e+00> : vector<2x1xf32>
    %46 = vector.multi_reduction <add>, %45, %cst_24 [1] : vector<2x8x1xf32> to vector<2x1xf32>
    %47 = vector.shape_cast %46 : vector<2x1xf32> to vector<2x1x1xf32>
    %48 = vector.broadcast %47 : vector<2x1x1xf32> to vector<2x8x1xf32>
    %49 = arith.divf %45, %48 : vector<2x8x1xf32>
    %50 = vector.extract_strided_slice %3 {offsets = [0, 0, 8], sizes = [2, 8, 8], strides = [1, 1, 1]} : vector<2x8x32xf32> to vector<2x8x8xf32>
    %51 = vector.broadcast %49 : vector<2x8x1xf32> to vector<2x8x8xf32>
    %52 = arith.mulf %51, %50 : vector<2x8x8xf32>
    %cst_25 = arith.constant dense<0.000000e+00> : vector<2x8xf32>
    %53 = vector.multi_reduction <add>, %52, %cst_25 [1] : vector<2x8x8xf32> to vector<2x8xf32>
    %c0_26 = arith.constant 0 : index
    %c0_27 = arith.constant 0 : index
    %c8 = arith.constant 8 : index
    %54 = vector.load %arg7[%c0_26, %c0_27, %c8] : memref<1x2x32xf32, #tpu.memory_space<vmem>>, vector<1x2x8xf32>
    %55 = vector.shape_cast %54 : vector<1x2x8xf32> to vector<2x8xf32>
    %56 = vector.shape_cast %53 : vector<2x8xf32> to vector<1x2x8xf32>
    tpu.vector_store %arg7[%c0_26, %c0_27, %c8], %56 {strides = array<i32>} : memref<1x2x32xf32, #tpu.memory_space<vmem>>, vector<1x2x8xf32>,
    %57 = vector.extract_strided_slice %18 {offsets = [0, 0, 16], sizes = [2, 8, 8], strides = [1, 1, 1]} : vector<2x8x32xf32> to vector<2x8x8xf32>
    %cst_28 = arith.constant dense<0.000000e+00> : vector<2x8xf32>
    %58 = vector.multi_reduction <add>, %57, %cst_28 [2] : vector<2x8x8xf32> to vector<2x8xf32>
    %59 = vector.shape_cast %58 : vector<2x8xf32> to vector<2x8x1xf32>
    %cst_29 = arith.constant dense<0xFF800000> : vector<2x1xf32>
    %60 = vector.multi_reduction <maximumf>, %59, %cst_29 [1] : vector<2x8x1xf32> to vector<2x1xf32>
    %61 = vector.shape_cast %60 : vector<2x1xf32> to vector<2x1x1xf32>
    %62 = vector.broadcast %61 : vector<2x1x1xf32> to vector<2x8x1xf32>
    %63 = arith.subf %59, %62 : vector<2x8x1xf32>
    %64 = math.exp %63 : vector<2x8x1xf32>
    %cst_30 = arith.constant dense<0.000000e+00> : vector<2x1xf32>
    %65 = vector.multi_reduction <add>, %64, %cst_30 [1] : vector<2x8x1xf32> to vector<2x1xf32>
    %66 = vector.shape_cast %65 : vector<2x1xf32> to vector<2x1x1xf32>
    %67 = vector.broadcast %66 : vector<2x1x1xf32> to vector<2x8x1xf32>
    %68 = arith.divf %64, %67 : vector<2x8x1xf32>
    %69 = vector.extract_strided_slice %3 {offsets = [0, 0, 16], sizes = [2, 8, 8], strides = [1, 1, 1]} : vector<2x8x32xf32> to vector<2x8x8xf32>
    %70 = vector.broadcast %68 : vector<2x8x1xf32> to vector<2x8x8xf32>
    %71 = arith.mulf %70, %69 : vector<2x8x8xf32>
    %cst_31 = arith.constant dense<0.000000e+00> : vector<2x8xf32>
    %72 = vector.multi_reduction <add>, %71, %cst_31 [1] : vector<2x8x8xf32> to vector<2x8xf32>
    %c0_32 = arith.constant 0 : index
    %c0_33 = arith.constant 0 : index
    %c16 = arith.constant 16 : index
    %73 = vector.load %arg7[%c0_32, %c0_33, %c16] : memref<1x2x32xf32, #tpu.memory_space<vmem>>, vector<1x2x8xf32>
    %74 = vector.shape_cast %73 : vector<1x2x8xf32> to vector<2x8xf32>
    %75 = vector.shape_cast %72 : vector<2x8xf32> to vector<1x2x8xf32>
    tpu.vector_store %arg7[%c0_32, %c0_33, %c16], %75 {strides = array<i32>} : memref<1x2x32xf32, #tpu.memory_space<vmem>>, vector<1x2x8xf32>,
    %76 = vector.extract_strided_slice %18 {offsets = [0, 0, 24], sizes = [2, 8, 8], strides = [1, 1, 1]} : vector<2x8x32xf32> to vector<2x8x8xf32>
    %cst_34 = arith.constant dense<0.000000e+00> : vector<2x8xf32>
    %77 = vector.multi_reduction <add>, %76, %cst_34 [2] : vector<2x8x8xf32> to vector<2x8xf32>
    %78 = vector.shape_cast %77 : vector<2x8xf32> to vector<2x8x1xf32>
    %cst_35 = arith.constant dense<0xFF800000> : vector<2x1xf32>
    %79 = vector.multi_reduction <maximumf>, %78, %cst_35 [1] : vector<2x8x1xf32> to vector<2x1xf32>
    %80 = vector.shape_cast %79 : vector<2x1xf32> to vector<2x1x1xf32>
    %81 = vector.broadcast %80 : vector<2x1x1xf32> to vector<2x8x1xf32>
    %82 = arith.subf %78, %81 : vector<2x8x1xf32>
    %83 = math.exp %82 : vector<2x8x1xf32>
    %cst_36 = arith.constant dense<0.000000e+00> : vector<2x1xf32>
    %84 = vector.multi_reduction <add>, %83, %cst_36 [1] : vector<2x8x1xf32> to vector<2x1xf32>
    %85 = vector.shape_cast %84 : vector<2x1xf32> to vector<2x1x1xf32>
    %86 = vector.broadcast %85 : vector<2x1x1xf32> to vector<2x8x1xf32>
    %87 = arith.divf %83, %86 : vector<2x8x1xf32>
    %88 = vector.extract_strided_slice %3 {offsets = [0, 0, 24], sizes = [2, 8, 8], strides = [1, 1, 1]} : vector<2x8x32xf32> to vector<2x8x8xf32>
    %89 = vector.broadcast %87 : vector<2x8x1xf32> to vector<2x8x8xf32>
    %90 = arith.mulf %89, %88 : vector<2x8x8xf32>
    %cst_37 = arith.constant dense<0.000000e+00> : vector<2x8xf32>
    %91 = vector.multi_reduction <add>, %90, %cst_37 [1] : vector<2x8x8xf32> to vector<2x8xf32>
    %c0_38 = arith.constant 0 : index
    %c0_39 = arith.constant 0 : index
    %c24 = arith.constant 24 : index
    %92 = vector.load %arg7[%c0_38, %c0_39, %c24] : memref<1x2x32xf32, #tpu.memory_space<vmem>>, vector<1x2x8xf32>
    %93 = vector.shape_cast %92 : vector<1x2x8xf32> to vector<2x8xf32>
    %94 = vector.shape_cast %91 : vector<2x8xf32> to vector<1x2x8xf32>
    tpu.vector_store %arg7[%c0_38, %c0_39, %c24], %94 {strides = array<i32>} : memref<1x2x32xf32, #tpu.memory_space<vmem>>, vector<1x2x8xf32>,
    return
  }
  func.func @transform_0(%arg0: i32) -> (i32, i32, i32) {
    %c0_i32 = arith.constant 0 : i32
    %c0_i32_0 = arith.constant 0 : i32
    %c0_i32_1 = arith.constant 0 : i32
    return %arg0, %c0_i32, %c0_i32_0 : i32, i32, i32
  }
  func.func @transform_1(%arg0: i32) -> (i32, i32, i32, i32) {
    %c0_i32 = arith.constant 0 : i32
    %c0_i32_0 = arith.constant 0 : i32
    %c0_i32_1 = arith.constant 0 : i32
    %c0_i32_2 = arith.constant 0 : i32
    return %arg0, %c0_i32, %c0_i32_0, %c0_i32_1 : i32, i32, i32, i32
  }
  func.func @transform_2(%arg0: i32) -> (i32, i32) {
    %c0_i32 = arith.constant 0 : i32
    %c0_i32_0 = arith.constant 0 : i32
    %c0_i32_1 = arith.constant 0 : i32
    return %c0_i32, %c0_i32_0 : i32, i32
  }
  func.func @transform_3(%arg0: i32) -> (i32, i32) {
    %c0_i32 = arith.constant 0 : i32
    %c0_i32_0 = arith.constant 0 : i32
    %c0_i32_1 = arith.constant 0 : i32
    return %c0_i32, %c0_i32_0 : i32, i32
  }
  func.func @transform_4(%arg0: i32) -> (i32, i32) {
    %c0_i32 = arith.constant 0 : i32
    %c0_i32_0 = arith.constant 0 : i32
    %c0_i32_1 = arith.constant 0 : i32
    return %c0_i32, %c0_i32_0 : i32, i32
  }
  func.func @transform_5(%arg0: i32) -> (i32, i32) {
    %c0_i32 = arith.constant 0 : i32
    %c0_i32_0 = arith.constant 0 : i32
    %c0_i32_1 = arith.constant 0 : i32
    return %c0_i32, %c0_i32_0 : i32, i32
  }
  func.func @transform_6(%arg0: i32) -> (i32, i32, i32) {
    %c0_i32 = arith.constant 0 : i32
    %c0_i32_0 = arith.constant 0 : i32
    %c0_i32_1 = arith.constant 0 : i32
    return %arg0, %c0_i32, %c0_i32_0 : i32, i32, i32
  }
}

</mosaic_0001>

<bundles_post_ra>
// kernel: tpu_custom_call.1
= control target key start
LH: loop header
LB: loop body
LE: loop exit
PB: predicated region body
PF: predicated region fallthrough
CT: control target
= control target key end

     0   :  { %s1729_s0 = inlined_call_operand.hbm [shape: f32[2,2,32], index: 0, kind: input, shape index: {}]   ;;  %s1730_s1 = inlined_call_operand.hbm [shape: f32[2,2,8,32], index: 1, kind: input, shape index: {}]   ;;  %s1731_s2 = inlined_call_operand.hbm [shape: f32[32,32], index: 2, kind: input, shape index: {}]   ;;  %s1732_s3 = inlined_call_operand.vmem [shape: f32[1,32], index: 3, kind: input, shape index: {}]   ;;  %s1733_s4 = inlined_call_operand.hbm [shape: f32[32,32], index: 4, kind: input, shape index: {}]   ;;  %s1734_s5 = inlined_call_operand.vmem [shape: f32[1,32], index: 5, kind: input, shape index: {}]   ;;  %s1735_s6 = inlined_call_operand.hbm [shape: f32[2,2,32], index: 6, kind: output, shape index: {}]  }
   0x1   :  { %1741 = sst [smem:[#allocation16_spill]] %s1729_s0 }
   0x2   :  { %1742 = sst [smem:[#allocation17_spill]] %s1731_s2 }
   0x3   :  { %11 = vsyncpa [#allocation3], 0 }
   0x4   :  { %13 = vsyncpa [#allocation3 + $0x1], 0 }
   0x5   :  { %14 = vsyncpa [#allocation6], 0 }
   0x6   :  { %16 = vsyncpa [#allocation6 + $0x1], 0 }
   0x7   :  { %17 = vsyncpa [#allocation9], 0 }
   0x8   :  { %18 = vsyncpa [#allocation4], 0 }
   0x9   :  { %20 = vsyncpa [#allocation4 + $0x1], 0  ;;  %s1381_s21 = smov 0   ;;  %s1383_s22 = smov 0  }
   0xa   :  { %s1385_s23 = smov 0   ;;  %s1387_s24 = smov 0  }
   0xb LB: > { %s1402_s25 = sadd.s32 4294967295, %s1330_s24   ;;  %s950_s26 = sadd.s32 4294967294, %s1330_s24   ;;  %s1330_s24 = sphi %s1387_s24, %s1766_s24   ;;  %s1326_s23 = sphi %s1385_s23, %s1765_s23   ;;  %s1322_s22 = sphi %s1383_s22, %s1764_s22   ;;  %s1318_s21 = sphi %s1381_s21, %s1763_s21  }
   0xc   : > { %p46_p0 = scmp.ne.s32.totalorder %s1322_s22, %s1318_s21  ;;  %p1736_p1 = scmp.eq.s32.totalorder %s1402_s25, 0 }
   0xd   : > { %p186_p3 = scmp.eq.s32.totalorder %s950_s26, 1  ;;  %p951_p5 = scmp.ge.s32.totalorder %s1330_s24, 1 }
   0xe   : > { %p1411_p4 = por %p1736_p1, %p46_p0  ;;  %p193_p7 = scmp.lt.s32.totalorder %s1330_s24, 3 }
   0xf   : > { %p1416_p6 = por %p186_p3, %p46_p0  ;;  %s1332_s30 = smov [#allocation7]  }
  0x10   : > { %s1743_s27 = scalar_select %p1411_p4, 1, 0 }
  0x11   : > { %s1744_s28 = scalar_select %p1416_p6, 1, 0 }
  0x12   : > { %p1421_p8 = pnand %p951_p5, %p193_p7  ;;  %s205_s7 = sshll.u32 %s1332_s30, 4  ;;  %s1425_s7 = int_to_ptr.vmem [resolvable:$true] %s205_s7 }
  0x13   : > { %s1333_s9 = smov [#allocation8]   ;;  %s1747_s2 = sld [smem:[#allocation17_spill]] }
  0x14   : > { %p1037_p9 = pneg %p1421_p8  ;;  %s221_s10 = sshll.u32 %s1333_s9, 4  ;;  %s1436_s10 = int_to_ptr.vmem [resolvable:$true] %s221_s10 }
  0x16   : > { %p1432_p11 = pnand %p1037_p9, %p1736_p1 }
  0x18   : > { %p1138_p13 = pneg %p1432_p11 }
  0x19   : > { %s1136_s13 = scalar_lea.hbm %s1747_s2, 512 }
  0x1a   : > { %p1137_p12 = scmp.ne.s32.totalorder %s1747_s2, %s1136_s13  ;;  %p1143_p5 = scmp.lt.u32.totalorder %s1136_s13, %s1747_s2 }
  0x1c   : > { %p1139_p0 = pnand %p1138_p13, %p1137_p12 }
  0x1e   : > { %p1140_p3 = pneg %p1139_p0 }
  0x20   : > { %p1145_p7 = pnand %p1143_p5, %p1140_p3 }
  0x22   : > { %1148 = shalt.err (!%p1145_p7)
}
  0x23   : > { %s1149_s18 = scalar_lea.vmem %s1425_s7, 512  ;;  %p1157_p2 = scmp.lt.s32.totalorder %s1425_s7, %s1425_s7 }
  0x24   : > { %p1150_p9 = scmp.ne.s32.totalorder %s1425_s7, %s1149_s18  ;;  %p1158_p12 = scmp.lt.s32.totalorder %s1149_s18, %s1149_s18 }
  0x26   : > { %p1152_p10 = pnand %p1150_p9, %p1138_p13  ;;  %p1159_p0 = por %p1158_p12, %p1157_p2 }
  0x28   : > { %p1153_p1 = pneg %p1152_p10 }
  0x2a   : > { %p1160_p6 = pnand %p1159_p0, %p1153_p1 }
  0x2c   : > { %1163 = shalt.err (!%p1160_p6)
}
  0x2d   : > { %s1737_s19 = smov 128   ;;  %s1738_s20 = smov 8  }
  0x2e   : > { %1040 = dma.hbm_to_vmem [thread:$0]  (!%p1432_p11), %s1747_s2, 512, %s1425_s7, [#allocation6], %s1737_s19, %s1737_s19, %s1738_s20  }
  0x2f   : > { %s1164_s12 = scalar_lea.hbm %s1733_s4, 512 }
  0x30   : > { %p1165_p1 = scmp.ne.s32.totalorder %s1733_s4, %s1164_s12  ;;  %p1171_p10 = scmp.lt.u32.totalorder %s1164_s12, %s1733_s4 }
  0x32   : > { %p1167_p2 = pnand %p1165_p1, %p1138_p13 }
  0x34   : > { %p1168_p6 = pneg %p1167_p2 }
  0x36   : > { %p1173_p3 = pnand %p1171_p10, %p1168_p6 }
  0x38   : > { %1176 = shalt.err (!%p1173_p3)
}
  0x39   : > { %s1177_s7 = scalar_lea.vmem %s1436_s10, 512  ;;  %p1185_p12 = scmp.lt.s32.totalorder %s1436_s10, %s1436_s10 }
  0x3a   : > { %p1178_p5 = scmp.ne.s32.totalorder %s1436_s10, %s1177_s7  ;;  %p1186_p0 = scmp.lt.s32.totalorder %s1177_s7, %s1177_s7 }
  0x3c   : > { %p1180_p7 = pnand %p1178_p5, %p1138_p13  ;;  %p1187_p1 = por %p1186_p0, %p1185_p12 }
  0x3e   : > { %p1181_p9 = pneg %p1180_p7 }
  0x40   : > { %p1188_p2 = pnand %p1187_p1, %p1181_p9 }
  0x42   : > { %1191 = shalt.err (!%p1188_p2)
}
  0x43   : > { %1043 = dma.hbm_to_vmem [thread:$0]  (!%p1432_p11), %s1733_s4, 512, %s1436_s10, [#allocation9], %s1737_s19, %s1737_s19, %s1738_s20  }
  0x44   : > { %s1497_s8 = sadd.s32 1, %s1330_s24   ;;  %s33_s26 = sadd.s32 1, %s1326_s23 }
  0x45   : > { %s30_s30 = ssub.s32 %s1330_s24, %s1497_s8  ;;  %p40_p13 = scmp.ne.s32.totalorder %s1326_s23, %s1322_s22 }
  0x46   : > { %p31_p6 = scmp.eq.s32.totalorder %s30_s30, 0  ;;  %p41_p10 = scmp.eq.s32.totalorder %s1330_s24, 0 }
  0x47   : > { %p1748_p3 = scmp.eq.s32.totalorder %s1402_s25, 1  ;;  %p1057_p7 = scmp.lt.s32.totalorder %s1330_s24, 2 }
  0x48   : > { %s1513_s11 = scalar_select %p31_p6, %s1326_s23, %s33_s26  }
  0x49   : > { %p1507_p5 = por %p1748_p3, %p40_p13  ;;  %p42_p9 = por %p41_p10, %p40_p13 }
  0x4a   : > { %s1516_s12 = sand.u32 1, %s1326_s23   ;;  %s956_s13 = sshll.u32 %s1330_s24, 5 }
  0x4b   : > { %s1749_s9 = scalar_select %p1507_p5, 1, 0 }
  0x4c   : > { %s955_s10 = sshll.u32 %s1516_s12, 1  ;;  %s1750_s0 = sld [smem:[#allocation16_spill]] }
  0x4d   : > { %s242_s7 = scalar_lea.vmem [#allocation2], %s955_s10  ;;  %p1527_p11 = pnand %p1057_p7, %p42_p9 }
  0x4e   : > { %s249_s17 = sshll.u32 %s242_s7, 4  ;;  %s957_s26 = sshll.u32 %s1516_s12, 4  ;;  %s1525_s17 = int_to_ptr.vmem [resolvable:$true] %s249_s17 }
  0x4f   : > { %s239_s19 = scalar_lea.sflag [#allocation3], %s1516_s12  ;;  %p1194_p0 = pneg %p1527_p11 }
  0x52   : > { %s1523_s16 = scalar_lea.hbm %s1750_s0, %s956_s13  ;;  %s1197_s15 = scalar_lea.hbm %s1750_s0, 64 }
  0x53   : > { %s1192_s14 = scalar_lea.hbm %s1523_s16, 32  ;;  %p1198_p13 = scmp.lt.u32.totalorder %s1523_s16, %s1750_s0 }
  0x54   : > { %p1193_p12 = scmp.ne.s32.totalorder %s1523_s16, %s1192_s14  ;;  %p1199_p6 = scmp.lt.u32.totalorder %s1197_s15, %s1192_s14 }
  0x55   : > { %p1201_p3 = scmp.lt.u32.totalorder %s1192_s14, %s1523_s16 }
  0x56   : > { %p1195_p1 = pnand %p1194_p0, %p1193_p12  ;;  %p1200_p10 = por %p1199_p6, %p1198_p13 }
  0x58   : > { %p1196_p2 = pneg %p1195_p1  ;;  %p1202_p7 = por %p1201_p3, %p1200_p10 }
  0x5a   : > { %p1203_p9 = pnand %p1202_p7, %p1196_p2 }
  0x5c   : > { %1206 = shalt.err (!%p1203_p9)
}
  0x5d   : > { %s1207_s30 = scalar_lea.vmem %s1525_s17, 32  ;;  %s1336_s10 = smov [#allocation2]  }
  0x5e   : > { %p1208_p12 = scmp.ne.s32.totalorder %s1525_s17, %s1207_s30  ;;  %s1212_s13 = sshll.u32 %s1336_s10, 4  ;;  %s1213_s13 = int_to_ptr.vmem [resolvable:$false] %s1212_s13 }
  0x5f   : > { %s1214_s20 = scalar_lea.vmem %s1213_s13, 64  ;;  %p1215_p4 = scmp.lt.s32.totalorder %s1525_s17, %s1213_s13 }
  0x60   : > { %p1210_p1 = pnand %p1208_p12, %p1194_p0  ;;  %p1216_p13 = scmp.lt.s32.totalorder %s1214_s20, %s1207_s30 }
  0x62   : > { %p1211_p5 = pneg %p1210_p1  ;;  %p1217_p6 = por %p1216_p13, %p1215_p4 }
  0x64   : > { %p1218_p10 = pnand %p1217_p6, %p1211_p5 }
  0x66   : > { %1221 = shalt.err (!%p1218_p10)
}
  0x67   : > { %1047 = dma.hbm_to_vmem [thread:$0]  (!%p1527_p11), %s1523_s16, 32, %s1525_s17, %s239_s19  }
  0x68   : > { %s260_s14 = scalar_lea.vmem [#allocation5], %s957_s26  ;;  %s975_s7 = sshll.u32 %s1330_s24, 8 }
  0x69   : > { %s267_s15 = sshll.u32 %s260_s14, 4  ;;  %s1567_s13 = scalar_lea.hbm %s1730_s1, %s975_s7  ;;  %s1561_s15 = int_to_ptr.vmem [resolvable:$true] %s267_s15 }
  0x6a   : > { %s1752_s20 = sand.u32 1, %s1330_s24   ;;  %s1222_s2 = scalar_lea.hbm %s1567_s13, 256 }
  0x6b   : > { %s1571_s0 = scalar_lea.sflag [#allocation6], %s1752_s20  ;;  %p1223_p4 = scmp.ne.s32.totalorder %s1567_s13, %s1222_s2 }
  0x6c   : > { %s1227_s16 = scalar_lea.hbm %s1730_s1, 512  ;;  %p1228_p3 = scmp.lt.u32.totalorder %s1567_s13, %s1730_s1 }
  0x6d   : > { %p1225_p5 = pnand %p1223_p4, %p1194_p0  ;;  %p1229_p7 = scmp.lt.u32.totalorder %s1227_s16, %s1222_s2 }
  0x6e   : > { %p1231_p12 = scmp.lt.u32.totalorder %s1222_s2, %s1567_s13 }
  0x6f   : > { %p1226_p2 = pneg %p1225_p5  ;;  %p1230_p9 = por %p1229_p7, %p1228_p3 }
  0x71   : > { %p1232_p1 = por %p1231_p12, %p1230_p9 }
  0x73   : > { %p1233_p13 = pnand %p1232_p1, %p1226_p2 }
  0x75   : > { %1236 = shalt.err (!%p1233_p13)
}
  0x76   : > { %s1237_s14 = scalar_lea.vmem %s1561_s15, 256  ;;  %s1337_s7 = smov [#allocation5]  }
  0x77   : > { %p1238_p6 = scmp.ne.s32.totalorder %s1561_s15, %s1237_s14  ;;  %s1242_s10 = sshll.u32 %s1337_s7, 4  ;;  %s1243_s10 = int_to_ptr.vmem [resolvable:$false] %s1242_s10 }
  0x78   : > { %s1244_s30 = scalar_lea.vmem %s1243_s10, 512  ;;  %p1245_p5 = scmp.lt.s32.totalorder %s1561_s15, %s1243_s10 }
  0x79   : > { %p1240_p10 = pnand %p1238_p6, %p1194_p0  ;;  %p1246_p3 = scmp.lt.s32.totalorder %s1244_s30, %s1237_s14 }
  0x7b   : > { %p1241_p4 = pneg %p1240_p10  ;;  %p1247_p7 = por %p1246_p3, %p1245_p5 }
  0x7d   : > { %p1248_p9 = pnand %p1247_p7, %p1241_p4 }
  0x7f   : > { %1251 = shalt.err (!%p1248_p9)
}
  0x80   : > { %s1753_s2 = smov 8   ;;  %s1754_s20 = smov 128  }
  0x81   : > { %1050 = dma.hbm_to_vmem [thread:$0]  (!%p1527_p11), %s1567_s13, 256, %s1561_s15, %s1571_s0, %s1754_s20, %s1754_s20, %s1753_s2  }
  0x82   : > { %279 = sbr.rel (%p1421_p8) target bundleno = 732 (0x2dc), region = 44  ;;  %s1603_s19 = sand.u32 (!%p1421_p8), 1, %s1322_s22  }
  0x83   : > { %s961_s12 = sshll.u32 (!%p1421_p8), %s1603_s19, 1  ;;  %s282_s16 = scalar_lea.sflag (!%p1421_p8), [#allocation3], %s1603_s19 }
  0x84   : > { %s1609_s18 = scalar_lea.vmem (!%p1421_p8), [#allocation2], %s961_s12  ;;  %p1755_p0 = scmp.ne.s32.totalorder (!%p1421_p8), %s1743_s27, 0 }
  0x89   : > { %1297 = dma.done.wait (%p1755_p0), %s282_s16, 32  }
  0x8a   : > { %1299 = vsyncadd (%p1755_p0), %s282_s16, 4294967264  ;;  %s290_s0 = sand.u32 1, %s1402_s25   ;;  %s962_s29 = sshll.u32 %s1603_s19, 4 }
  0x8b   : > { %s291_s15 = scalar_lea.sflag [#allocation6], %s290_s0  ;;  %s1617_s13 = scalar_lea.vmem [#allocation5], %s962_s29 }
  0x8c   : > { %1301 = dma.done.wait (%p1755_p0), %s291_s15, 256  }
  0x8d   : > { %1303 = vsyncadd (%p1755_p0), %s291_s15, 4294967040  ;;  %p1756_p8 = scmp.eq.s32.totalorder %s1402_s25, 0 }
  0x8f   : > { %1305 = dma.done.wait (%p1756_p8), [#allocation6], 512   ;;  %p1757_p11 = pmov %p1756_p8 }
  0x90   : > { %p1758_p2 = pmov %p1756_p8 }
  0x91   : > { %1307 = vsyncadd (%p1757_p11), [#allocation6], 4294966784 }
  0x92   : > { %1309 = dma.done.wait (%p1758_p2), [#allocation9], 512   ;;  %p1759_p12 = pmov %p1758_p2 }
  0x93   : > { %v1338_v0 = vmov 0.0|0.0   ;;  %vm1339_vm0 = vmmov 0   ;;  %v1340_v1 = vmov 0.0   ;;  %v339_v2 = vld [vmem:[#allocation7] sm:$0xff]  ;;  %v340_v3 = vld [vmem:[#allocation7 + $0x8] sm:$0xff]  ;;  %v341_v7 = vld [vmem:[#allocation7 + $0x10] sm:$0xff]  ;;  %v520_v19 = vlaneseq }
  0x94   : > { %1311 = vsyncadd (%p1759_p12), [#allocation9], 4294966784  ;;  %1009 = vmatprep.subr.bf16.mxu0 %v1338_v0  ;;  %995 = vmatprep.mubr.msk.f32.mxu0 %vm1339_vm0, %v1340_v1  ;;  %v424_v4 = vld [vmem:[#allocation8] sm:$0xff]  ;;  %v1010_v5 = vpack.c.bf16 %v340_v3, %v339_v2  ;;  %v425_v6 = vld [vmem:[#allocation8 + $0x8] sm:$0xff]  ;;  %vm350_vm1 = vcmask 261120   ;;  %s1342_s7 = smov 112  }
  0x95   : > { %v342_v8 = vld [vmem:[#allocation7 + $0x18] sm:$0xff]  ;;  %v1015_v9 = vpack.c.bf16 %v425_v6, %v424_v4  ;;  %v426_v10 = vld [vmem:[#allocation8 + $0x10] sm:$0xff]  ;;  %v1341_v17 = vmov 1966171168   ;;  %v521_v21 = vshrl.u32 %v520_v19, 7  ;;  %s1343_s10 = smov 120  }
  0x96   : > { %v427_v11 = vld [vmem:[#allocation8 + $0x18] sm:$0xff]  ;;  %1011 = vmatpush3.bf16.msra.mxu0 %v1010_v5  ;;  %v1013_v12 = vpack.c.bf16 %v342_v8, %v341_v7  ;;  %v1632_v14 = vld [vmem:[%s1617_s13] sm:$0xff]  ;;  %v518_v18 = vunpack.c.l.s4 %v1341_v17  ;;  %s1344_s30 = smov 104   ;;  %vm551_vm2 = vcmask 64512   ;;  %vm610_vm3 = vcmask 1041409   ;;  %s1661_s2 = scalar_lea.vmem [#allocation10], %s961_s12 }
  0x97   : > { %v1019_v13 = vpack.c.bf16 %v427_v11, %v426_v10  ;;  %1012 = vmatprep.subr.bf16.mxu0 %v1338_v0  ;;  %1016 = vmatprep.subr.bf16.mxu1 %v1015_v9  ;;  %v336_v15 = vld [vmem:[%s1609_s18] sm:$0x3]  ;;  %v541_v30 = vsub.s32 0, %v521_v21  ;;  %vm613_vm4 = vcmask 58368   ;;  %vm665_vm5 = vcmask 130112   ;;  %s972_s20 = sshll.u32 %s1402_s25, 5 }
  0x98   : > { %1018 = vmatpush3.bf16.msra.mxu1 %v1015_v9  ;;  %1006 = vmatprep.mubr.msk.f32.mxu1 %vm350_vm1, %v1632_v14  ;;  %v1637_v16 = vld [vmem:[%s1617_s13 + $0x8] sm:$0xff]  ;;  %v519_v20 = vunpack.c.0.s8 %v518_v18  ;;  %vm734_vm6 = vcmask 195712   ;;  %vm803_vm7 = vcmask 261312   ;;  %vm684_vm8 = vcmask 123968   ;;  %s838_s12 = sshll.u32 %s1661_s2, 4  ;;  %s1683_s0 = scalar_lea.hbm %s1735_s6, %s972_s20  ;;  %s1685_s12 = int_to_ptr.vmem [resolvable:$true] %s838_s12 }
  0x99   : > { %1020 = vmatprep.subr.bf16.mxu1 %v1019_v13  ;;  %v966_v22 = vld [vmem:[%s1732_s3] ss:$0 sm:$0xff]  ;;  %vm753_vm9 = vcmask 189568   ;;  %vm822_vm10 = vcmask 255168   ;;  %s825_s29 = scalar_lea.sflag [#allocation4], %s1603_s19  ;;  %s1252_s15 = scalar_lea.vmem %s1685_s12, 32 }
  0x9a   : > { %1014 = vmatpush3.bf16.msra.mxu0 %v1013_v12  ;;  %v522_v23 = vsub.s32 %v519_v20, %v521_v21  ;;  %v968_v28 = vld [vmem:[%s1734_s5] ss:$0 sm:$0xff]  ;;  %p1253_p1 = scmp.ne.s32.totalorder %s1685_s12, %s1252_s15  ;;  %p1760_p13 = scmp.ne.s32.totalorder %s1749_s9, 0 }
  0x9b   : > { %s1345_s25 = smov [#allocation10]  }
  0x9c   : > { %1022 = vmatpush3.bf16.msra.mxu1 %v1019_v13  ;;  %p1254_p6 = pnand %p1253_p1, %p1760_p13  ;;  %s1256_s13 = sshll.u32 %s1345_s25, 4  ;;  %s1257_s13 = int_to_ptr.vmem [resolvable:$false] %s1256_s13 }
  0x9d   : > { %996 = vmatmul.mubr.msk.f32.vlgmr.msra.gmra.mrb[0].mxu0 %vm350_vm1, %v336_v15  ;;  %s1258_s27 = scalar_lea.vmem %s1257_s13, 64  ;;  %p1259_p4 = scmp.lt.s32.totalorder %s1685_s12, %s1257_s13 }
  0x9e   : > { %p1255_p10 = pneg %p1254_p6  ;;  %p1260_p5 = scmp.lt.s32.totalorder %s1258_s27, %s1252_s15 }
  0x9f   : > { %1007 = vmatmul.mubr.msk.f32.vlgmr.msra.gmra.mrb[0].mxu1 %vm350_vm1, %v1637_v16 }
  0xa0   : > { %p1261_p3 = por %p1260_p5, %p1259_p4 }
  0xa2   : > { %p1262_p7 = pnand %p1261_p3, %p1255_p10 }
 0x170   : > { %v420_v24 = vpop.f32.mrb[0].mxu0 }
 0x171   : > { %v421_v25 = vadd.f32 %v966_v22, %v420_v24  ;;  %v997_v26 = vpop.f32.mrb[1].mxu0 }
 0x172   : > { %v1008_v27 = vpop.f32.mrb[0].mxu1 }
 0x173   : > { %v523_v29 = vrot.slane %v421_v25, %v522_v23  ;;  %v507_v31 = vpop.f32.mrb[1].mxu1  ;;  %v513_v37 = vadd.f32 %v1008_v27, %v968_v28 }
 0x174   : > { %v508_v34 = vadd.f32 %v968_v28, %v507_v31 }
 0x175   : > { %v524_v32 = vcombine.high %v523_v29, %v523_v29  ;;  %v531_v33 = vrot.slane %v523_v29, %v522_v23 }
 0x177   : > { %v538_v35 = vrot.slane %v524_v32, %v522_v23  ;;  %v542_v36 = vrot.slane %v531_v33, %v541_v30 }
 0x179   : > { %v546_v38 = vrot.slane %v538_v35, %v541_v30  ;;  %v549_v39 = vmul.f32 %v542_v36, %v508_v34 }
 0x17b   : > { %v550_v40 = vmul.f32 %v546_v38, %v513_v37  ;;  %686 = vrot.lane.b32.xlu1 %v549_v39, %s1342_s7  ;;  %617 = vrot.lane.b32.xlu0 %v549_v39, %s1343_s10  ;;  %v552_v41 = vsel %vm551_vm2, %v549_v39, 0.0 }
 0x17d   : > { %v555_v42 = vsel %vm551_vm2, %v550_v40, 0.0 }
 0x17f   : > { %688 = vrot.lane.b32.xlu1 %v550_v40, %s1342_s7  ;;  %619 = vrot.lane.b32.xlu0 %v550_v40, %s1343_s10 }
 0x183   : > { %757 = vrot.lane.b32.xlu1 %v550_v40, %s1344_s30  ;;  %755 = vrot.lane.b32.xlu0 %v549_v39, %s1344_s30 }
 0x1a2   : > { %553 = vadd.xlane.f32.xlu0 %v552_v41 }
 0x1a7   : > { %556 = vadd.xlane.f32.xlu1 %v555_v42 }
 0x1ed   : > { %v687_v43 = vpop.permute.xlu1 %686  ;;  %v618_v44 = vpop.permute.xlu0 %617 }
 0x1ee   : > { %v623_v45 = vsel %vm551_vm2, %v618_v44, 0.0  ;;  %v692_v46 = vsel %vm551_vm2, %v687_v43, 0.0 }
 0x1ef   : > { %624 = vadd.xlane.f32.xlu0 %v623_v45  ;;  %693 = vadd.xlane.f32.xlu1 %v692_v46 }
 0x1f1   : > { %v689_v47 = vpop.permute.xlu1 %688  ;;  %v620_v48 = vpop.permute.xlu0 %619 }
 0x1f2   : > { %v626_v49 = vsel %vm551_vm2, %v620_v48, 0.0  ;;  %v695_v51 = vsel %vm551_vm2, %v689_v47, 0.0 }
 0x1f3   : > { %627 = vadd.xlane.f32.xlu0 %v626_v49 }
 0x1f5   : > { %v756_v50 = vpop.permute.xlu0 %755  ;;  %v758_v53 = vpop.permute.xlu1 %757 }
 0x1f6   : > { %v761_v52 = vsel %vm551_vm2, %v756_v50, 0.0  ;;  %v764_v54 = vsel %vm551_vm2, %v758_v53, 0.0 }
 0x1f7   : > { %696 = vadd.xlane.f32.xlu0 %v695_v51  ;;  %762 = vadd.xlane.f32.xlu1 %v761_v52 }
 0x1fb   : > { %765 = vadd.xlane.f32.xlu0 %v764_v54 }
 0x22f   : > { %v554_v55 = vpop.xlane.xlu0 %553 }
 0x230   : > { %v558_v56 = vrot.slane %v554_v55, 4 }
 0x232   : > { %v559_v57 = vmax.f32 %v554_v55, %v558_v56 }
 0x234   : > { %v560_v58 = vrot.slane %v559_v57, 2  ;;  %v557_v59 = vpop.xlane.xlu1 %556 }
 0x235   : > { %v564_v60 = vrot.slane %v557_v59, 4 }
 0x236   : > { %v561_v61 = vmax.f32 %v559_v57, %v560_v58 }
 0x237   : > { %v565_v62 = vmax.f32 %v557_v59, %v564_v60 }
 0x238   : > { %v562_v63 = vrot.slane %v561_v61, 1 }
 0x239   : > { %v566_v0 = vrot.slane %v565_v62, 2 }
 0x23a   : > { %v563_v1 = vmax.f32 %v561_v61, %v562_v63 }
 0x23b   : > { %v567_v2 = vmax.f32 %v565_v62, %v566_v0 }
 0x23c   : > { %v570_v3 = vsub.f32 %v554_v55, %v563_v1 }
 0x23d   : > { %v568_v4 = vrot.slane %v567_v2, 1 }
 0x23e   : > { %v572_v5 = vmul.f32 1.442695, %v570_v3 }
 0x23f   : > { %v569_v6 = vmax.f32 %v567_v2, %v568_v4 }
 0x240   : > { %1104 = vpow2.f32 %v572_v5 }
 0x241   : > { %v571_v7 = vsub.f32 %v557_v59, %v569_v6 }
 0x243   : > { %v574_v8 = vmul.f32 1.442695, %v571_v7 }
 0x245   : > { %1106 = vpow2.f32 %v574_v8 }
 0x24a   : > { %v1105_v9 = vpop.eup %1104 }
 0x24b   : > { %v576_v10 = vrot.slane %v1105_v9, 4 }
 0x24d   : > { %v577_v11 = vadd.f32 %v1105_v9, %v576_v10 }
 0x24f   : > { %v1107_v12 = vpop.eup %1106  ;;  %v578_v13 = vrot.slane %v577_v11, 2 }
 0x250   : > { %v582_v15 = vrot.slane %v1107_v12, 4 }
 0x251   : > { %v579_v17 = vadd.f32 %v578_v13, %v577_v11 }
 0x252   : > { %v583_v18 = vadd.f32 %v1107_v12, %v582_v15 }
 0x253   : > { %v580_v19 = vrot.slane %v579_v17, 1 }
 0x254   : > { %v584_v20 = vrot.slane %v583_v18, 2 }
 0x255   : > { %v581_v21 = vadd.f32 %v580_v19, %v579_v17 }
 0x256   : > { %v585_v22 = vadd.f32 %v584_v20, %v583_v18 }
 0x257   : > { %1108 = vrcp.f32 %v581_v21 }
 0x258   : > { %v586_v23 = vrot.slane %v585_v22, 1 }
 0x25a   : > { %v587_v24 = vadd.f32 %v586_v23, %v585_v22 }
 0x25c   : > { %1110 = vrcp.f32 %v587_v24 }
 0x261   : > { %v1109_v25 = vpop.eup %1108 }
 0x262   : > { %v589_v26 = vmul.f32 %v1109_v25, %v1105_v9 }
 0x264   : > { %v592_v27 = vmul.f32 %v589_v26, %v1632_v14 }
 0x266   : > { %v1111_v28 = vpop.eup %1110  ;;  %v594_v29 = vsel %vm551_vm2, %v592_v27, 0.0 }
 0x267   : > { %v591_v30 = vmul.f32 %v1111_v28, %v1107_v12  ;;  %v595_v31 = vrot.slane %v594_v29, 4 }
 0x269   : > { %v593_v32 = vmul.f32 %v591_v30, %v1637_v16  ;;  %v596_v33 = vadd.f32 %v595_v31, %v594_v29 }
 0x26b   : > { %v597_v34 = vrot.slane %v596_v33, 2  ;;  %v601_v35 = vsel %vm551_vm2, %v593_v32, 0.0 }
 0x26c   : > { %v602_v36 = vrot.slane %v601_v35, 4 }
 0x26d   : > { %v598_v37 = vadd.f32 %v597_v34, %v596_v33 }
 0x26e   : > { %v603_v38 = vadd.f32 %v602_v36, %v601_v35 }
 0x26f   : > { %v599_v40 = vrot.slane %v598_v37, 1 }
 0x270   : > { %v604_v39 = vrot.slane %v603_v38, 2 }
 0x271   : > { %v600_v43 = vadd.f32 %v599_v40, %v598_v37 }
 0x272   : > { %v605_v41 = vadd.f32 %v604_v39, %v603_v38 }
 0x274   : > { %v606_v42 = vrot.slane %v605_v41, 1 }
 0x276   : > { %v607_v44 = vadd.f32 %v606_v42, %v605_v41 }
 0x278   : > { %v611_v45 = vsel %vm610_vm3, %v607_v44, %v600_v43 }
 0x279   : > { %614 = vst.msk [vmem:[%s1661_s2] sm:$0x3] %vm613_vm4, %v611_v45 }
 0x27c   : > { %v625_v46 = vpop.xlane.xlu0 %624  ;;  %v694_v47 = vpop.xlane.xlu1 %693 }
 0x27d   : > { %v629_v48 = vrot.slane %v625_v46, 4  ;;  %v698_v49 = vrot.slane %v694_v47, 4 }
 0x27f   : > { %v630_v50 = vmax.f32 %v625_v46, %v629_v48  ;;  %v699_v51 = vmax.f32 %v694_v47, %v698_v49 }
 0x280   : > { %v628_v52 = vpop.xlane.xlu0 %627 }
 0x281   : > { %v631_v53 = vrot.slane %v630_v50, 2  ;;  %v700_v54 = vrot.slane %v699_v51, 2  ;;  %v635_v55 = vrot.slane %v628_v52, 4 }
 0x283   : > { %v632_v56 = vmax.f32 %v630_v50, %v631_v53  ;;  %v701_v57 = vmax.f32 %v699_v51, %v700_v54  ;;  %v636_v58 = vmax.f32 %v628_v52, %v635_v55 }
 0x284   : > { %v697_v59 = vpop.xlane.xlu0 %696  ;;  %v763_v60 = vpop.xlane.xlu1 %762 }
 0x285   : > { %v633_v61 = vrot.slane %v632_v56, 1  ;;  %v702_v62 = vrot.slane %v701_v57, 1  ;;  %v637_v63 = vrot.slane %v636_v58, 2  ;;  %v704_v0 = vrot.slane %v697_v59, 4 }
 0x286   : > { %v767_v1 = vrot.slane %v763_v60, 4 }
 0x287   : > { %v634_v2 = vmax.f32 %v632_v56, %v633_v61  ;;  %v703_v3 = vmax.f32 %v701_v57, %v702_v62  ;;  %v638_v4 = vmax.f32 %v636_v58, %v637_v63  ;;  %v705_v5 = vmax.f32 %v697_v59, %v704_v0 }
 0x288   : > { %v768_v6 = vmax.f32 %v763_v60, %v767_v1  ;;  %v766_v7 = vpop.xlane.xlu0 %765 }
 0x289   : > { %v641_v8 = vsub.f32 %v625_v46, %v634_v2  ;;  %v710_v9 = vsub.f32 %v694_v47, %v703_v3  ;;  %v639_v10 = vrot.slane %v638_v4, 1  ;;  %v706_v11 = vrot.slane %v705_v5, 2 }
 0x28a   : > { %v769_v12 = vrot.slane %v768_v6, 2  ;;  %v773_v13 = vrot.slane %v766_v7, 4 }
 0x28b   : > { %v643_v15 = vmul.f32 1.442695, %v641_v8  ;;  %v712_v17 = vmul.f32 1.442695, %v710_v9  ;;  %v640_v18 = vmax.f32 %v638_v4, %v639_v10  ;;  %v707_v19 = vmax.f32 %v705_v5, %v706_v11 }
 0x28c   : > { %v770_v20 = vmax.f32 %v768_v6, %v769_v12  ;;  %v774_v21 = vmax.f32 %v766_v7, %v773_v13 }
 0x28d   : > { %1112 = vpow2.f32 %v643_v15  ;;  %v642_v22 = vsub.f32 %v628_v52, %v640_v18  ;;  %v708_v23 = vrot.slane %v707_v19, 1 }
 0x28e   : > { %1114 = vpow2.f32 %v712_v17  ;;  %v771_v24 = vrot.slane %v770_v20, 1  ;;  %v775_v25 = vrot.slane %v774_v21, 2 }
 0x28f   : > { %v645_v26 = vmul.f32 1.442695, %v642_v22  ;;  %v709_v27 = vmax.f32 %v707_v19, %v708_v23 }
 0x290   : > { %v772_v28 = vmax.f32 %v770_v20, %v771_v24  ;;  %v776_v29 = vmax.f32 %v774_v21, %v775_v25 }
 0x291   : > { %1116 = vpow2.f32 %v645_v26  ;;  %v711_v30 = vsub.f32 %v697_v59, %v709_v27 }
 0x292   : > { %v779_v31 = vsub.f32 %v763_v60, %v772_v28  ;;  %v777_v32 = vrot.slane %v776_v29, 1 }
 0x293   : > { %v714_v33 = vmul.f32 1.442695, %v711_v30 }
 0x294   : > { %v781_v34 = vmul.f32 1.442695, %v779_v31  ;;  %v778_v35 = vmax.f32 %v776_v29, %v777_v32 }
 0x295   : > { %1118 = vpow2.f32 %v714_v33 }
 0x296   : > { %1120 = vpow2.f32 %v781_v34  ;;  %v780_v36 = vsub.f32 %v766_v7, %v778_v35 }
 0x297   : > { %v1113_v37 = vpop.eup %1112 }
 0x298   : > { %v1115_v38 = vpop.eup %1114  ;;  %v647_v39 = vrot.slane %v1113_v37, 4  ;;  %v783_v40 = vmul.f32 1.442695, %v780_v36 }
 0x299   : > { %v716_v41 = vrot.slane %v1115_v38, 4 }
 0x29a   : > { %v648_v42 = vadd.f32 %v1113_v37, %v647_v39  ;;  %1122 = vpow2.f32 %v783_v40 }
 0x29b   : > { %v1117_v43 = vpop.eup %1116  ;;  %v717_v44 = vadd.f32 %v1115_v38, %v716_v41 }
 0x29c   : > { %v649_v45 = vrot.slane %v648_v42, 2  ;;  %v653_v46 = vrot.slane %v1117_v43, 4 }
 0x29d   : > { %v718_v47 = vrot.slane %v717_v44, 2 }
 0x29e   : > { %v650_v48 = vadd.f32 %v649_v45, %v648_v42  ;;  %v654_v49 = vadd.f32 %v1117_v43, %v653_v46 }
 0x29f   : > { %v1119_v50 = vpop.eup %1118  ;;  %v719_v51 = vadd.f32 %v718_v47, %v717_v44 }
 0x2a0   : > { %v1121_v52 = vpop.eup %1120  ;;  %v651_v53 = vrot.slane %v650_v48, 1  ;;  %v655_v54 = vrot.slane %v654_v49, 2  ;;  %v722_v55 = vrot.slane %v1119_v50, 4 }
 0x2a1   : > { %v720_v56 = vrot.slane %v719_v51, 1  ;;  %v785_v57 = vrot.slane %v1121_v52, 4 }
 0x2a2   : > { %v652_v58 = vadd.f32 %v651_v53, %v650_v48  ;;  %v656_v59 = vadd.f32 %v655_v54, %v654_v49  ;;  %v723_v60 = vadd.f32 %v1119_v50, %v722_v55 }
 0x2a3   : > { %v721_v61 = vadd.f32 %v720_v56, %v719_v51  ;;  %v786_v62 = vadd.f32 %v1121_v52, %v785_v57 }
 0x2a4   : > { %v1123_v63 = vpop.eup %1122  ;;  %1124 = vrcp.f32 %v652_v58  ;;  %v657_v0 = vrot.slane %v656_v59, 1  ;;  %v724_v1 = vrot.slane %v723_v60, 2 }
 0x2a5   : > { %1126 = vrcp.f32 %v721_v61  ;;  %v787_v2 = vrot.slane %v786_v62, 2  ;;  %v791_v3 = vrot.slane %v1123_v63, 4 }
 0x2a6   : > { %v658_v4 = vadd.f32 %v657_v0, %v656_v59  ;;  %v725_v5 = vadd.f32 %v724_v1, %v723_v60 }
 0x2a7   : > { %v788_v6 = vadd.f32 %v787_v2, %v786_v62  ;;  %v792_v7 = vadd.f32 %v1123_v63, %v791_v3 }
 0x2a8   : > { %1128 = vrcp.f32 %v658_v4  ;;  %v726_v8 = vrot.slane %v725_v5, 1 }
 0x2a9   : > { %v789_v9 = vrot.slane %v788_v6, 1  ;;  %v793_v10 = vrot.slane %v792_v7, 2 }
 0x2aa   : > { %v727_v11 = vadd.f32 %v726_v8, %v725_v5 }
 0x2ab   : > { %v790_v12 = vadd.f32 %v789_v9, %v788_v6  ;;  %v794_v13 = vadd.f32 %v793_v10, %v792_v7 }
 0x2ac   : > { %1130 = vrcp.f32 %v727_v11 }
 0x2ad   : > { %1132 = vrcp.f32 %v790_v12  ;;  %v795_v15 = vrot.slane %v794_v13, 1 }
 0x2ae   : > { %v1125_v17 = vpop.eup %1124 }
 0x2af   : > { %v1127_v18 = vpop.eup %1126  ;;  %v660_v19 = vmul.f32 %v1125_v17, %v1113_v37  ;;  %v796_v20 = vadd.f32 %v795_v15, %v794_v13 }
 0x2b0   : > { %v729_v21 = vmul.f32 %v1127_v18, %v1115_v38 }
 0x2b1   : > { %v663_v22 = vmul.f32 %v660_v19, %v1632_v14  ;;  %1134 = vrcp.f32 %v796_v20 }
 0x2b2   : > { %v1129_v23 = vpop.eup %1128  ;;  %v732_v24 = vmul.f32 %v729_v21, %v1632_v14 }
 0x2b3   : > { %v662_v25 = vmul.f32 %v1129_v23, %v1117_v43  ;;  %v666_v26 = vsel %vm665_vm5, %v663_v22, 0.0 }
 0x2b4   : > { %v667_v27 = vrot.slane %v666_v26, 4  ;;  %v735_v28 = vsel %vm734_vm6, %v732_v24, 0.0 }
 0x2b5   : > { %v664_v29 = vmul.f32 %v662_v25, %v1637_v16  ;;  %v736_v30 = vrot.slane %v735_v28, 4 }
 0x2b6   : > { %v1131_v31 = vpop.eup %1130  ;;  %v668_v32 = vadd.f32 %v667_v27, %v666_v26 }
 0x2b7   : > { %v1133_v33 = vpop.eup %1132  ;;  %v731_v34 = vmul.f32 %v1131_v31, %v1119_v50  ;;  %v673_v35 = vsel %vm665_vm5, %v664_v29, 0.0  ;;  %v737_v36 = vadd.f32 %v736_v30, %v735_v28 }
 0x2b8   : > { %v669_v37 = vrot.slane %v668_v32, 2  ;;  %v674_v38 = vrot.slane %v673_v35, 4  ;;  %v798_v39 = vmul.f32 %v1133_v33, %v1121_v52 }
 0x2b9   : > { %v733_v40 = vmul.f32 %v731_v34, %v1637_v16  ;;  %v738_v41 = vrot.slane %v737_v36, 2 }
 0x2ba   : > { %v670_v42 = vadd.f32 %v669_v37, %v668_v32  ;;  %v675_v43 = vadd.f32 %v674_v38, %v673_v35  ;;  %v801_v44 = vmul.f32 %v798_v39, %v1632_v14 }
 0x2bb   : > { %v1135_v45 = vpop.eup %1134  ;;  %v742_v46 = vsel %vm734_vm6, %v733_v40, 0.0  ;;  %v739_v50 = vadd.f32 %v738_v41, %v737_v36 }
 0x2bc   : > { %v676_v47 = vrot.slane %v675_v43, 2  ;;  %v743_v48 = vrot.slane %v742_v46, 4  ;;  %v800_v49 = vmul.f32 %v1135_v45, %v1123_v63  ;;  %v804_v51 = vsel %vm803_vm7, %v801_v44, 0.0 }
 0x2bd   : > { %v671_v53 = vrot.slane %v670_v42, 1  ;;  %v805_v56 = vrot.slane %v804_v51, 4  ;;  %v740_v0 = vrot.slane %v739_v50, 1 }
 0x2be   : > { %v677_v54 = vadd.f32 %v676_v47, %v675_v43  ;;  %v744_v55 = vadd.f32 %v743_v48, %v742_v46  ;;  %v802_v52 = vmul.f32 %v800_v49, %v1637_v16 }
 0x2bf   : > { %v806_v14 = vadd.f32 %v805_v56, %v804_v51  ;;  %v672_v61 = vadd.f32 %v671_v53, %v670_v42  ;;  %v741_v6 = vadd.f32 %v740_v0, %v739_v50 }
 0x2c0   : > { %v678_v57 = vrot.slane %v677_v54, 1  ;;  %v745_v58 = vrot.slane %v744_v55, 2  ;;  %v811_v59 = vsel %vm803_vm7, %v802_v52, 0.0 }
 0x2c1   : > { %v812_v60 = vrot.slane %v811_v59, 4  ;;  %v807_v1 = vrot.slane %v806_v14, 2 }
 0x2c2   : > { %v679_v62 = vadd.f32 %v678_v57, %v677_v54  ;;  %v746_v63 = vadd.f32 %v745_v58, %v744_v55 }
 0x2c3   : > { %v813_v2 = vadd.f32 %v812_v60, %v811_v59  ;;  %v808_v4 = vadd.f32 %v807_v1, %v806_v14 }
 0x2c4   : > { %v682_v3 = vsel %vm610_vm3, %v679_v62, %v672_v61  ;;  %v747_v16 = vrot.slane %v746_v63, 1 }
 0x2c5   : > { %685 = vst.msk [vmem:[%s1661_s2] sm:$0x3] %vm684_vm8, %v682_v3  ;;  %v814_v5 = vrot.slane %v813_v2, 2  ;;  %v809_v8 = vrot.slane %v808_v4, 1 }
 0x2c6   : > { %v748_v7 = vadd.f32 %v747_v16, %v746_v63 }
 0x2c7   : > { %v815_v9 = vadd.f32 %v814_v5, %v813_v2  ;;  %v810_v12 = vadd.f32 %v809_v8, %v808_v4 }
 0x2c8   : > { %v751_v10 = vsel %vm610_vm3, %v748_v7, %v741_v6 }
 0x2c9   : > { %754 = vst.msk [vmem:[%s1661_s2] sm:$0x3] %vm753_vm9, %v751_v10  ;;  %v816_v11 = vrot.slane %v815_v9, 1 }
 0x2cb   : > { %v817_v13 = vadd.f32 %v816_v11, %v815_v9 }
 0x2cd   : > { %v820_v15 = vsel %vm610_vm3, %v817_v13, %v810_v12 }
 0x2ce   : > { %823 = vst.msk [vmem:[%s1661_s2] sm:$0x3] %vm822_vm10, %v820_v15 }
 0x2cf   : > { %1265 = shalt.err (!%p1262_p7)
}
 0x2d0   : > { %s1266_s19 = scalar_lea.hbm %s1683_s0, 32  ;;  %s1270_s14 = scalar_lea.hbm %s1735_s6, 64 }
 0x2d1   : > { %p1267_p9 = scmp.ne.s32.totalorder %s1683_s0, %s1266_s19  ;;  %p1271_p11 = scmp.lt.u32.totalorder %s1683_s0, %s1735_s6 }
 0x2d2   : > { %p1272_p2 = scmp.lt.u32.totalorder %s1270_s14, %s1266_s19  ;;  %p1274_p1 = scmp.lt.u32.totalorder %s1266_s19, %s1683_s0 }
 0x2d3   : > { %p1268_p0 = pnand %p1267_p9, %p1760_p13 }
 0x2d4   : > { %p1273_p12 = por %p1272_p2, %p1271_p11 }
 0x2d5   : > { %p1269_p8 = pneg %p1268_p0 }
 0x2d6   : > { %p1275_p6 = por %p1274_p1, %p1273_p12 }
 0x2d8   : > { %p1276_p10 = pnand %p1275_p6, %p1269_p8 }
 0x2da   : > { %1279 = shalt.err (!%p1276_p10)
}
 0x2db   : > { %1035 = dma.vmem_to_hbm [thread:$0]  (%p1760_p13), %s1685_s12, 32, %s1683_s0, %s825_s29  }
 0x2dc PF: > { %s850_s30 = sand.u32 1, %s1318_s21   ;;  %p1761_p4 = scmp.ne.s32.totalorder %s1744_s28, 0 }
 0x2dd   : > { %p1762_p5 = scmp.ge.s32.totalorder %s1330_s24, 2  ;;  %s851_s2 = scalar_lea.sflag [#allocation4], %s850_s30 }
 0x2df   : > { %p1052_p3 = pnand %p1762_p5, %p1761_p4 }
 0x2e1   : > { %1313 = dma.done.wait (!%p1052_p3), %s851_s2, 32  }
 0x2e2   : > { %1315 = vsyncadd (!%p1052_p3), %s851_s2, 4294967264  ;;  %p23_p7 = scmp.ge.s32.totalorder %s1497_s8, 4   ;;  %s1763_s21 = smov %s1322_s22 }
 0x2e3   : > { %s1764_s22 = smov %s1326_s23  ;;  %s1765_s23 = smov %s1513_s11 }
 0x2e4   : > { %s1766_s24 = smov %s1497_s8  ;;  %25 = sbr.rel (!%p23_p7) target bundleno = 11 (0xb), region = 110 }
 0x2eb   :  { %856 = vsyncpa [#allocation3], 1 }
 0x2ec   :  { %858 = vsyncpa [#allocation3 + $0x1], 1 }
 0x2ed   :  { %859 = vsyncpa [#allocation6], 1 }
 0x2ee   :  { %861 = vsyncpa [#allocation6 + $0x1], 1 }
 0x2ef   :  { %862 = vsyncpa [#allocation9], 1 }
 0x2f0   :  { %863 = vsyncpa [#allocation4], 1 }
 0x2f1   :  { %865 = vsyncpa [#allocation4 + $0x1], 1 }

</bundles_post_ra>
